<compile_context>
chip_gen: v6e
topology: v6e:2x2x1
jax: 0.10.0
libtpu: 0.0.40
codegen_flags: <defaults>
</compile_context>

<pallas_src>
import functools

import jax
import jax.numpy as jnp
from jax.experimental import pallas as pl
from jax.experimental.pallas import tpu as pltpu


def _round_up(n, m):
    return ((n + m - 1) // m) * m


def _vmem_capacity_bytes():
    """Per-core VMEM capacity, generation aware, with a conservative default."""
    try:
        return int(pltpu.get_tpu_info().vmem_capacity_bytes)
    except Exception:
        return 64 * 1024 * 1024  # v7x per-TC size; safe lower bound everywhere.


def _chip_generation():
    """Best-effort TPU generation (0 if unknown)."""
    try:
        kind = jax.devices()[0].device_kind.lower()
        for g in (7, 6, 5, 4):
            if f"v{g}" in kind:
                return g
    except Exception:
        pass
    return 0


# ---------------------------------------------------------------------------
# Path 1: fused per-batch kernel (one (1, C, HW) slab per grid step).
# ---------------------------------------------------------------------------
def _ca_fused_kernel(x_ref, w1_ref, b1_ref, w2_ref, b2_ref, o_ref, *,
                     inv_hw, native_dtype_scale):
    # x_ref/o_ref: (1, C, HW); w1: (C_sq, C); b1: (1, C_sq); w2: (C, C_sq);
    # b2: (1, C).  Mean + squeeze-excite in f32 on VPU/XLU (not MXU).
    mean = jnp.sum(x_ref[...].astype(jnp.float32), axis=-1) * inv_hw   # (1, C)

    w1 = w1_ref[...].astype(jnp.float32)
    b1 = b1_ref[...].astype(jnp.float32)
    w2 = w2_ref[...].astype(jnp.float32)
    b2 = b2_ref[...].astype(jnp.float32)

    # 1x1 conv #1 (C -> C_sq) + ReLU, then 1x1 conv #2 (C_sq -> C) + sigmoid.
    h = jnp.maximum(jnp.sum(w1[None] * mean[:, None, :], axis=-1) + b1, 0.0)
    s = jax.nn.sigmoid(jnp.sum(w2[None] * h[:, None, :], axis=-1) + b2)  # (1,C)

    # Re-read x_ref for the scale so no whole-slab f32 temporary is kept live
    # across the mean + SE computation (matters for bf16 near the cutoff).
    if native_dtype_scale:
        o_ref[...] = x_ref[...] * s.astype(o_ref.dtype)[:, :, None]
    else:
        o_ref[...] = (x_ref[...].astype(jnp.float32)
                      * s[:, :, None]).astype(o_ref.dtype)


def _channel_attention_fused(x_flat, w1, b1, w2, b2, *, native_dtype_scale,
                             vmem_limit):
    B, C, HW = x_flat.shape
    C_sq = w1.shape[0]
    b1_2d = b1.reshape(1, C_sq)
    b2_2d = b2.reshape(1, C)

    def big_spec():
        if B == 1:
            # Single grid step: double-buffering the slab buys nothing.
            return pl.BlockSpec((1, C, HW), lambda b: (b, 0, 0),
                                pipeline_mode=pl.Buffered(1))
        return pl.BlockSpec((1, C, HW), lambda b: (b, 0, 0))

    kernel = functools.partial(_ca_fused_kernel, inv_hw=1.0 / float(HW),
                               native_dtype_scale=native_dtype_scale)

    # TODO(synk): plumb jit-level donation (donate_argnums) + input_output_aliases
    # if true in-place operation on x is ever needed.
    return pl.pallas_call(
        kernel,
        out_shape=jax.ShapeDtypeStruct((B, C, HW), x_flat.dtype),
        grid_spec=pltpu.PrefetchScalarGridSpec(
            num_scalar_prefetch=0,
            grid=(B,),
            in_specs=[
                big_spec(),
                pl.BlockSpec((C_sq, C), lambda b: (0, 0)),
                pl.BlockSpec((1, C_sq), lambda b: (0, 0)),
                pl.BlockSpec((C, C_sq), lambda b: (0, 0)),
                pl.BlockSpec((1, C), lambda b: (0, 0)),
            ],
            out_specs=big_spec(),
        ),
        compiler_params=pltpu.CompilerParams(
            dimension_semantics=("parallel",),
            vmem_limit_bytes=vmem_limit),
    )(x_flat, w1, b1_2d, w2, b2_2d)


# ---------------------------------------------------------------------------
# Path 2: two-pass tiled fallback (inputs too large for the fused path).
# ---------------------------------------------------------------------------
def _channel_attention_two_pass(x_flat, w1, b1, w2, b2, *, tile_hw,
                                native_dtype_scale, budget):
    B, C, HW = x_flat.shape
    dtype = x_flat.dtype
    itemsize = dtype.itemsize

    # Size the HW tile by bytes (~4 MiB per block) so each grid step moves
    # enough data to amortize the ~0.35 us per-step overhead; a fixed lane
    # count is overhead-bound for small C.
    max_tile = _round_up(HW, 128)
    if tile_hw is None:
        target_block_bytes = 4 * 1024 * 1024
        tile_hw = _round_up(max(target_block_bytes // (C * itemsize), 512), 128)
    tile_hw = max(128, min(_round_up(tile_hw, 128), max_tile))
    n_t = pl.cdiv(HW, tile_hw)
    rem = HW - (n_t - 1) * tile_hw          # valid lanes in the last tile
    inv_hw = 1.0 / float(HW)

    # VMEM: 2 in + 2 out tile buffers plus f32 cast intermediates + slack.
    tile_bytes = C * tile_hw * itemsize
    f32_tile_bytes = C * tile_hw * 4
    vmem_limit = int(min(budget,
                         max(4 * tile_bytes + 2 * f32_tile_bytes + (4 << 20),
                             16 << 20)))

    # ---- pass 1: per-(b, c) mean over HW, f32 accumulation in the output ---
    def mean_kernel(x_ref, mean_ref):
        t = pl.program_id(1)

        @pl.when(t == 0)
        def _():
            mean_ref[...] = jnp.zeros_like(mean_ref)

        x = x_ref[...].astype(jnp.float32)               # (1, C, tile_hw)

        if rem != tile_hw:
            # Mask the padded tail only on the last (partial) tile.
            @pl.when(t != n_t - 1)
            def _():
                mean_ref[...] += jnp.sum(x, axis=-1)[:, None, :]

            @pl.when(t == n_t - 1)
            def _():
                col = jax.lax.broadcasted_iota(jnp.int32, x.shape, 2)
                xm = jnp.where(col < rem, x, 0.0)
                mean_ref[...] += jnp.sum(xm, axis=-1)[:, None, :]
        else:
            mean_ref[...] += jnp.sum(x, axis=-1)[:, None, :]

        @pl.when(t == n_t - 1)
        def _():
            mean_ref[...] = mean_ref[...] * inv_hw

    # TODO(synk): for v7x with B == 1, split the HW reduction into two
    # "parallel" halves (partial sums combined in the SE step) so both
    # TensorCores work during pass 1.
    mean3 = pl.pallas_call(
        mean_kernel,
        out_shape=jax.ShapeDtypeStruct((B, 1, C), jnp.float32),
        grid_spec=pltpu.PrefetchScalarGridSpec(
            num_scalar_prefetch=0,
            grid=(B, n_t),
            in_specs=[pl.BlockSpec((1, C, tile_hw), lambda b, t: (b, 0, t))],
            out_specs=pl.BlockSpec((1, 1, C), lambda b, t: (b, 0, 0)),
        ),
        compiler_params=pltpu.CompilerParams(
            dimension_semantics=("parallel", "arbitrary"),
            vmem_limit_bytes=vmem_limit),
    )(x_flat)

    # ---- squeeze-excite in plain JAX (tiny (B,C)->(B,C_sq)->(B,C)) ---------
    mean = mean3[:, 0, :]                                             # (B, C)
    h = jnp.maximum(mean @ w1.astype(jnp.float32).T
                    + b1.astype(jnp.float32), 0.0)
    s = jax.nn.sigmoid(h @ w2.astype(jnp.float32).T
                       + b2.astype(jnp.float32))                      # (B, C)
    s3 = s.astype(dtype if native_dtype_scale else jnp.float32).reshape(B, C, 1)

    # ---- pass 2: elementwise per-channel scale, lane-dense HW tiles --------
    def scale_kernel(x_ref, s_ref, o_ref):
        if native_dtype_scale:
            # Native bf16 multiply on v6e/v7x: halves VALU work + vreg use.
            o_ref[...] = x_ref[...] * s_ref[...]
        else:
            o_ref[...] = (x_ref[...].astype(jnp.float32)
                          * s_ref[...]).astype(o_ref.dtype)

    out = pl.pallas_call(
        scale_kernel,
        out_shape=jax.ShapeDtypeStruct((B, C, HW), dtype),
        grid_spec=pltpu.PrefetchScalarGridSpec(
            num_scalar_prefetch=0,
            grid=(B, n_t),
            in_specs=[
                pl.BlockSpec((1, C, tile_hw), lambda b, t: (b, 0, t)),
                pl.BlockSpec((1, C, 1), lambda b, t: (b, 0, 0)),
            ],
            out_specs=pl.BlockSpec((1, C, tile_hw), lambda b, t: (b, 0, t)),
        ),
        compiler_params=pltpu.CompilerParams(
            dimension_semantics=("parallel", "parallel"),
            vmem_limit_bytes=vmem_limit),
    )(x_flat, s3)
    return out


# ---------------------------------------------------------------------------
# Public wrapper.
# ---------------------------------------------------------------------------
@functools.partial(jax.jit, static_argnames=("force_two_pass", "tile_hw"))
def channel_attention(x, w1, b1, w2, b2, *, force_two_pass=False, tile_hw=None):
    """RCAN ChannelAttention forward.

    x: (B, C, H, W) f32 or bf16.  w1: (C//sq, C), b1: (C//sq,),
    w2: (C, C//sq), b2: (C,).  Returns (B, C, H, W) in x.dtype.
    """
    B, C, H, W = x.shape
    HW = H * W
    x_flat = x.reshape(B, C, HW)
    dtype = x.dtype

    # Generation-aware VMEM budget (v5e/v6e: 128 MiB, v7x: 64 MiB per TC).
    budget = int(_vmem_capacity_bytes() * 0.80)

    gen = _chip_generation()
    # v6e/v7x have native bf16 VPU: multiply in bf16 there; v5e and f32
    # inputs keep the f32 multiply (mean/SE math is always f32).
    native_dtype_scale = (dtype == jnp.bfloat16) and gen >= 6

    # Per-step fused VMEM need: in/out slab buffers (single-buffered when
    # B == 1), an allowance for the in-kernel f32 cast of non-f32 inputs,
    # the tiny SE params, and fixed slack.
    per_block = C * HW * dtype.itemsize
    n_buf = 2 if B == 1 else 4
    f32_tmp = C * HW * 4 if dtype != jnp.float32 else 0
    param_bytes = 4 * (w1.size + b1.size + w2.size + b2.size)
    fused_need = n_buf * per_block + f32_tmp + 2 * param_bytes + (2 << 20)

    use_fused = (not force_two_pass) and fused_need <= budget
    if use_fused:
        vmem_limit = int(min(budget, max(2 * fused_need, 16 << 20)))
        out_flat = _channel_attention_fused(
            x_flat, w1, b1, w2, b2,
            native_dtype_scale=native_dtype_scale, vmem_limit=vmem_limit)
    else:
        out_flat = _channel_attention_two_pass(
            x_flat, w1, b1, w2, b2, tile_hw=tile_hw,
            native_dtype_scale=native_dtype_scale, budget=budget)
    return out_flat.reshape(B, C, H, W)


def channel_attention_ref(x, w1, b1, w2, b2):
    """Pure-JAX reference mirroring the PyTorch module semantics."""
    xf = x.astype(jnp.float32)
    mean = jnp.mean(xf, axis=(2, 3))                                   # (B, C)
    h = jnp.maximum(mean @ w1.astype(jnp.float32).T
                    + b1.astype(jnp.float32), 0.0)
    s = jax.nn.sigmoid(h @ w2.astype(jnp.float32).T
                       + b2.astype(jnp.float32))
    return (xf * s[:, :, None, None]).astype(x.dtype)


if __name__ == "__main__":
    # Shapes consistent with the module: num_feat=32, squeeze_factor=16.
    B, C, H, W = 2, 32, 16, 16
    squeeze_factor = 16
    C_sq = C // squeeze_factor

    key = jax.random.PRNGKey(0)
    kx, k1, k2, k3, k4 = jax.random.split(key, 5)
    x = jax.random.normal(kx, (B, C, H, W), dtype=jnp.float32)
    # PyTorch Conv2d 1x1 weights are (out_ch, in_ch, 1, 1); spatial dims squeezed.
    w1 = jax.random.normal(k1, (C_sq, C), dtype=jnp.float32) * 0.1
    b1 = jax.random.normal(k2, (C_sq,), dtype=jnp.float32) * 0.1
    w2 = jax.random.normal(k3, (C, C_sq), dtype=jnp.float32) * 0.1
    b2 = jax.random.normal(k4, (C,), dtype=jnp.float32) * 0.1

    # Fused path, B > 1: per-batch grid pipelines DMA with compute.
    out = jax.block_until_ready(channel_attention(x, w1, b1, w2, b2))
    ref = channel_attention_ref(x, w1, b1, w2, b2)
    assert out.shape == (B, C, H, W)
    assert jnp.allclose(out, ref, atol=1e-5, rtol=1e-5)

    # Fused path, B == 1: exercises the single-buffered (Buffered(1)) slabs.
    x1 = x[:1]
    out1 = jax.block_until_ready(channel_attention(x1, w1, b1, w2, b2))
    ref1 = channel_attention_ref(x1, w1, b1, w2, b2)
    assert jnp.allclose(out1, ref1, atol=1e-5, rtol=1e-5)

    # Two-pass tiled fallback, including masking of a partial last HW tile.
    H2 = W2 = 20                      # HW=400; tile=256 -> partial tail tile
    x2 = jax.random.normal(kx, (B, C, H2, W2), dtype=jnp.float32)
    out2 = jax.block_until_ready(
        channel_attention(x2, w1, b1, w2, b2, force_two_pass=True, tile_hw=256))
    ref2 = channel_attention_ref(x2, w1, b1, w2, b2)
    assert jnp.allclose(out2, ref2, atol=1e-5, rtol=1e-5)

    print("KERNEL_OK")
</pallas_src>

<mosaic_0001>
module attributes {stable_mosaic.version = 11 : i64} {
  func.func @_ca_fused_kernel(%arg0: i32, %arg1: memref<1x32x256xf32, #tpu.memory_space<vmem>>, %arg2: memref<2x32xf32, #tpu.memory_space<vmem>>, %arg3: memref<1x2xf32, #tpu.memory_space<vmem>>, %arg4: memref<32x2xf32, #tpu.memory_space<vmem>>, %arg5: memref<1x32xf32, #tpu.memory_space<vmem>>, %arg6: memref<1x32x256xf32, #tpu.memory_space<vmem>>) attributes {dimension_semantics = [#tpu.dimension_semantics<parallel>], iteration_bounds = array<i64: 2>, scalar_prefetch = 0 : i64, scratch_operands = 0 : i64, tpu.core_type = #tpu.core_type<tc>, window_params = [{transform_indices = @transform_0, window_bounds = array<i64: 1, 32, 256>}, {pipeline_mode = #tpu.pipeline_mode<synchronous>, transform_indices = @transform_1, window_bounds = array<i64: 2, 32>}, {pipeline_mode = #tpu.pipeline_mode<synchronous>, transform_indices = @transform_2, window_bounds = array<i64: 1, 2>}, {pipeline_mode = #tpu.pipeline_mode<synchronous>, transform_indices = @transform_3, window_bounds = array<i64: 32, 2>}, {pipeline_mode = #tpu.pipeline_mode<synchronous>, transform_indices = @transform_4, window_bounds = array<i64: 1, 32>}, {transform_indices = @transform_5, window_bounds = array<i64: 1, 32, 256>}]} {
    %c0 = arith.constant 0 : index
    %c0_0 = arith.constant 0 : index
    %c0_1 = arith.constant 0 : index
    %0 = vector.load %arg1[%c0, %c0_0, %c0_1] : memref<1x32x256xf32, #tpu.memory_space<vmem>>, vector<1x32x256xf32>
    %cst = arith.constant dense<0.000000e+00> : vector<1x32xf32>
    %1 = vector.multi_reduction <add>, %0, %cst [2] : vector<1x32x256xf32> to vector<1x32xf32>
    %cst_2 = arith.constant 3.906250e-03 : f32
    %2 = vector.broadcast %cst_2 : f32 to vector<1x32xf32>
    %3 = arith.mulf %1, %2 : vector<1x32xf32>
    %c0_3 = arith.constant 0 : index
    %c0_4 = arith.constant 0 : index
    %4 = vector.load %arg2[%c0_3, %c0_4] : memref<2x32xf32, #tpu.memory_space<vmem>>, vector<2x32xf32>
    %c0_5 = arith.constant 0 : index
    %c0_6 = arith.constant 0 : index
    %5 = vector.load %arg3[%c0_5, %c0_6] : memref<1x2xf32, #tpu.memory_space<vmem>>, vector<1x2xf32>
    %c0_7 = arith.constant 0 : index
    %c0_8 = arith.constant 0 : index
    %6 = vector.load %arg4[%c0_7, %c0_8] : memref<32x2xf32, #tpu.memory_space<vmem>>, vector<32x2xf32>
    %c0_9 = arith.constant 0 : index
    %c0_10 = arith.constant 0 : index
    %7 = vector.load %arg5[%c0_9, %c0_10] : memref<1x32xf32, #tpu.memory_space<vmem>>, vector<1x32xf32>
    %8 = vector.shape_cast %4 : vector<2x32xf32> to vector<1x2x32xf32>
    %9 = vector.shape_cast %3 : vector<1x32xf32> to vector<1x1x32xf32>
    %10 = vector.broadcast %9 : vector<1x1x32xf32> to vector<1x2x32xf32>
    %11 = arith.mulf %8, %10 : vector<1x2x32xf32>
    %cst_11 = arith.constant dense<0.000000e+00> : vector<1x2xf32>
    %12 = vector.multi_reduction <add>, %11, %cst_11 [2] : vector<1x2x32xf32> to vector<1x2xf32>
    %13 = arith.addf %12, %5 : vector<1x2xf32>
    %cst_12 = arith.constant 0.000000e+00 : f32
    %14 = vector.broadcast %cst_12 : f32 to vector<1x2xf32>
    %15 = arith.maximumf %13, %14 : vector<1x2xf32>
    %16 = vector.shape_cast %6 : vector<32x2xf32> to vector<1x32x2xf32>
    %17 = vector.shape_cast %15 : vector<1x2xf32> to vector<1x1x2xf32>
    %18 = vector.broadcast %17 : vector<1x1x2xf32> to vector<1x32x2xf32>
    %19 = arith.mulf %16, %18 : vector<1x32x2xf32>
    %cst_13 = arith.constant dense<0.000000e+00> : vector<1x32xf32>
    %20 = vector.multi_reduction <add>, %19, %cst_13 [2] : vector<1x32x2xf32> to vector<1x32xf32>
    %21 = arith.addf %20, %7 : vector<1x32xf32>
    %22 = arith.negf %21 : vector<1x32xf32>
    %23 = math.exp %22 : vector<1x32xf32>
    %cst_14 = arith.constant 1.000000e+00 : f32
    %24 = vector.broadcast %cst_14 : f32 to vector<1x32xf32>
    %25 = arith.addf %24, %23 : vector<1x32xf32>
    %26 = arith.divf %24, %25 : vector<1x32xf32>
    %c0_15 = arith.constant 0 : index
    %c0_16 = arith.constant 0 : index
    %c0_17 = arith.constant 0 : index
    %27 = vector.load %arg1[%c0_15, %c0_16, %c0_17] : memref<1x32x256xf32, #tpu.memory_space<vmem>>, vector<1x32x256xf32>
    %28 = vector.shape_cast %26 : vector<1x32xf32> to vector<1x32x1xf32>
    %29 = vector.broadcast %28 : vector<1x32x1xf32> to vector<1x32x256xf32>
    %30 = arith.mulf %27, %29 : vector<1x32x256xf32>
    %c0_18 = arith.constant 0 : index
    %c0_19 = arith.constant 0 : index
    %c0_20 = arith.constant 0 : index
    %31 = vector.load %arg6[%c0_18, %c0_19, %c0_20] : memref<1x32x256xf32, #tpu.memory_space<vmem>>, vector<1x32x256xf32>
    tpu.vector_store %arg6[%c0_18, %c0_19, %c0_20], %30 {strides = array<i32>} : memref<1x32x256xf32, #tpu.memory_space<vmem>>, vector<1x32x256xf32>,
    return
  }
  func.func @transform_0(%arg0: i32) -> (i32, i32, i32) {
    %c0_i32 = arith.constant 0 : i32
    %c0_i32_0 = arith.constant 0 : i32
    %c0_i32_1 = arith.constant 0 : i32
    return %arg0, %c0_i32, %c0_i32_0 : i32, i32, i32
  }
  func.func @transform_1(%arg0: i32) -> (i32, i32) {
    %c0_i32 = arith.constant 0 : i32
    %c0_i32_0 = arith.constant 0 : i32
    %c0_i32_1 = arith.constant 0 : i32
    return %c0_i32, %c0_i32_0 : i32, i32
  }
  func.func @transform_2(%arg0: i32) -> (i32, i32) {
    %c0_i32 = arith.constant 0 : i32
    %c0_i32_0 = arith.constant 0 : i32
    %c0_i32_1 = arith.constant 0 : i32
    return %c0_i32, %c0_i32_0 : i32, i32
  }
  func.func @transform_3(%arg0: i32) -> (i32, i32) {
    %c0_i32 = arith.constant 0 : i32
    %c0_i32_0 = arith.constant 0 : i32
    %c0_i32_1 = arith.constant 0 : i32
    return %c0_i32, %c0_i32_0 : i32, i32
  }
  func.func @transform_4(%arg0: i32) -> (i32, i32) {
    %c0_i32 = arith.constant 0 : i32
    %c0_i32_0 = arith.constant 0 : i32
    %c0_i32_1 = arith.constant 0 : i32
    return %c0_i32, %c0_i32_0 : i32, i32
  }
  func.func @transform_5(%arg0: i32) -> (i32, i32, i32) {
    %c0_i32 = arith.constant 0 : i32
    %c0_i32_0 = arith.constant 0 : i32
    %c0_i32_1 = arith.constant 0 : i32
    return %arg0, %c0_i32, %c0_i32_0 : i32, i32, i32
  }
}

</mosaic_0001>

<bundles_post_ra>
// kernel: channel_attention.1
= control target key start
LH: loop header
LB: loop body
LE: loop exit
PB: predicated region body
PF: predicated region fallthrough
CT: control target
= control target key end

     0   :  { %s570_s18 = smov 0   ;;  %s647_s0 = inlined_call_operand.vmem [shape: f32[2,32,256], index: 0, kind: input, shape index: {}]   ;;  %s648_s1 = inlined_call_operand.vmem [shape: f32[2,32], index: 1, kind: input, shape index: {}]   ;;  %s649_s2 = inlined_call_operand.vmem [shape: f32[1,2], index: 2, kind: input, shape index: {}]   ;;  %s650_s3 = inlined_call_operand.vmem [shape: f32[32,2], index: 3, kind: input, shape index: {}]   ;;  %s651_s4 = inlined_call_operand.vmem [shape: f32[1,32], index: 4, kind: input, shape index: {}]   ;;  %s652_s5 = inlined_call_operand.vmem [shape: f32[2,32,256], index: 5, kind: output, shape index: {}]  }
   0x1 LB: > { %s485_s19 = sadd.s32 4294967295, %s537_s18   ;;  %p489_p0 = scmp.ge.s32.totalorder %s537_s18, 1  ;;  %s537_s18 = sphi %s570_s18, %s15_s18  }
   0x2   : > { %p187_p1 = scmp.lt.s32.totalorder %s537_s18, 3 }
   0x4   : > { %p188_p2 = pnand %p489_p0, %p187_p1 }
   0x5   : > { %p215_p3 = scmp.lt.s32.totalorder (!%p188_p2), %s485_s19, 1 }
   0x6   : > { %191 = sbr.rel (%p188_p2) target bundleno = 752 (0x2f0), region = 40 }
   0xb   : > { %s654_s19 = smov (!%p215_p3, %s485_s19), 1  ;;  %v494_v12 = vld [vmem:[%s649_s2] ss:$0 sm:$0xff]  ;;  %v260_v13 = vlaneseq  ;;  %vm271_vm0 = vcmask 130112   ;;  %vm278_vm1 = vcmask 195712   ;;  %vm285_vm2 = vcmask 261312  }
   0xc   : > { %s502_s20 = sshll.u32 %s654_s19, 6  ;;  %v249_v36 = vld [vmem:[%s648_s1] sm:$0x3]  ;;  %vm289_vm3 = vcmask 254976   ;;  %v539_v41 = vmov 0   ;;  %v252_v48 = vld [vmem:[%s650_s3 + $0x8] sm:$0xff] }
   0xd   : > { %s219_s23 = scalar_lea.vmem %s647_s0, %s502_s20  ;;  %v261_v14 = vand.u32 127, %v260_v13  ;;  %v263_v15 = vshrl.u32 %v260_v13, 7  ;;  %513 = vset.pattern.permute.xlu0 %v539_v41  ;;  %514 = vset.pattern.permute.xlu1 %v539_v41  ;;  %v495_v42 = vld [vmem:[%s651_s4] ss:$0 sm:$0xff]  ;;  %vm329_vm4 = vcmask 15360   ;;  %v253_v51 = vld [vmem:[%s650_s3 + $0x10] sm:$0xff]  ;;  %s224_s15 = scalar_lea.vmem %s652_s5, %s502_s20 }
   0xe   : > { %v586_v0 = vld [vmem:[%s219_s23] sm:$0xff]  ;;  %v588_v1 = vld [vmem:[%s219_s23 + $0x8] sm:$0xff]  ;;  %v596_v5 = vld [vmem:[%s219_s23 + $0x10] sm:$0xff] }
   0xf   : > { %v590_v2 = vld [vmem:[%s219_s23 + $0x20] sm:$0xff]  ;;  %v233_v3 = vadd.f32 %v588_v1, %v586_v0  ;;  %v594_v4 = vld [vmem:[%s219_s23 + $0x28] sm:$0xff]  ;;  %v598_v6 = vld [vmem:[%s219_s23 + $0x18] sm:$0xff]  ;;  %v266_v16 = vadd.s32 4294967288, %v261_v14  ;;  %v273_v18 = vadd.s32 4294967280, %v261_v14  ;;  %v280_v19 = vadd.s32 4294967272, %v261_v14 }
  0x10   : > { %v239_v7 = vadd.f32 %v594_v4, %v590_v2  ;;  %v602_v8 = vld [vmem:[%s219_s23 + $0x30] sm:$0xff]  ;;  %v604_v9 = vld [vmem:[%s219_s23 + $0x38] sm:$0xff]  ;;  %v236_v10 = vadd.f32 %v598_v6, %v596_v5  ;;  %v264_v21 = vsub.s32 %v261_v14, %v263_v15  ;;  %v251_v49 = vld [vmem:[%s650_s3] sm:$0xff] }
  0x11   : > { %234 = vadd.xlane.f32.xlu0 %v233_v3  ;;  %v242_v11 = vadd.f32 %v604_v9, %v602_v8  ;;  %v269_v23 = vsub.s32 %v266_v16, %v263_v15  ;;  %v276_v24 = vsub.s32 %v273_v18, %v263_v15  ;;  %v283_v27 = vsub.s32 %v280_v19, %v263_v15  ;;  %v254_v57 = vld [vmem:[%s650_s3 + $0x18] sm:$0xff] }
  0x12   : > { %240 = vadd.xlane.f32.xlu1 %v239_v7 }
  0x15   : > { %237 = vadd.xlane.f32.xlu0 %v236_v10 }
  0x16   : > { %243 = vadd.xlane.f32.xlu1 %v242_v11 }
  0x27   : > { %299 = vbcast.lane.b32.xlu1 %v494_v12, 256 }
  0x2b   : > { %348 = vbcast.lane.b32.xlu1 %v495_v42, 256 }
  0x2f   : > { %352 = vbcast.lane.b32.xlu1 %v495_v42, 264 }
  0x9a   : > { %v235_v17 = vpop.xlane.xlu0 %234 }
  0x9b   : > { %v241_v20 = vpop.xlane.xlu1 %240  ;;  %v245_v22 = vmul.f32 0.00390625, %v235_v17 }
  0x9c   : > { %v247_v25 = vmul.f32 0.00390625, %v241_v20 }
  0x9d   : > { %v265_v31 = vrot.slane %v245_v22, %v264_v21 }
  0x9e   : > { %v238_v26 = vpop.xlane.xlu0 %237  ;;  %v277_v33 = vrot.slane %v247_v25, %v276_v24 }
  0x9f   : > { %v246_v28 = vmul.f32 0.00390625, %v238_v26  ;;  %v244_v29 = vpop.xlane.xlu1 %243 }
  0xa0   : > { %v248_v30 = vmul.f32 0.00390625, %v244_v29 }
  0xa1   : > { %v270_v32 = vrot.slane %v246_v28, %v269_v23 }
  0xa2   : > { %v284_v34 = vrot.slane %v248_v30, %v283_v27 }
  0xa3   : > { %v272_v35 = vsel %vm271_vm0, %v270_v32, %v265_v31  ;;  %v300_v43 = vpop.permute.xlu1 %299 }
  0xa4   : > { %v279_v37 = vsel %vm278_vm1, %v277_v33, %v272_v35 }
  0xa5   : > { %v286_v38 = vsel %vm285_vm2, %v284_v34, %v279_v37 }
  0xa6   : > { %v288_v39 = vmul.f32 %v286_v38, %v249_v36 }
  0xa7   : > { %v349_v61 = vpop.permute.xlu1 %348 }
  0xa8   : > { %v290_v40 = vsel %vm289_vm3, %v288_v39, 0.0 }
  0xa9   : > { %291 = vadd.xlane.f32.xlu0 %v290_v40 }
  0xab   : > { %v353_v62 = vpop.permute.xlu1 %352 }
 0x132   : > { %v292_v44 = vpop.xlane.xlu0 %291 }
 0x133   : > { %v302_v45 = vadd.f32 %v300_v43, %v292_v44 }
 0x135   : > { %v303_v46 = vmax.f32 %v302_v45, 0.0 }
 0x137   : > { %306 = vperm.xlu0 %513, %v303_v46  }
 0x1b2   : > { %v307_v47 = vpop.permute.xlu0 %306 }
 0x1b3   : > { %v311_v50 = vrot.slane %v307_v47, %v264_v21 }
 0x1b5   : > { %v326_v52 = vmul.f32 %v311_v50, %v252_v48  ;;  %v325_v53 = vmul.f32 %v311_v50, %v251_v49  ;;  %v327_v56 = vmul.f32 %v311_v50, %v253_v51  ;;  %v328_v59 = vmul.f32 %v311_v50, %v254_v57 }
 0x1b7   : > { %v333_v54 = vsel %vm329_vm4, %v326_v52, 0.0  ;;  %v330_v55 = vsel %vm329_vm4, %v325_v53, 0.0  ;;  %v336_v58 = vsel %vm329_vm4, %v327_v56, 0.0  ;;  %v339_v60 = vsel %vm329_vm4, %v328_v59, 0.0 }
 0x1b8   : > { %334 = vadd.xlane.f32.xlu0 %v333_v54  ;;  %331 = vadd.xlane.f32.xlu1 %v330_v55 }
 0x1bc   : > { %337 = vadd.xlane.f32.xlu1 %v336_v58 }
 0x1c0   : > { %340 = vadd.xlane.f32.xlu1 %v339_v60 }
 0x1ce   : > { %356 = vbcast.lane.b32.xlu0 %v495_v42, 272 }
 0x1d1   : > { %360 = vbcast.lane.b32.xlu1 %v495_v42, 280 }
 0x241   : > { %v335_v63 = vpop.xlane.xlu0 %334  ;;  %v332_v3 = vpop.xlane.xlu1 %331 }
 0x242   : > { %v367_v7 = vadd.f32 %v353_v62, %v335_v63  ;;  %v366_v10 = vadd.f32 %v349_v61, %v332_v3 }
 0x244   : > { %v497_v11 = vmul.f32 -1.442695, %v367_v7  ;;  %v496_v12 = vmul.f32 -1.442695, %v366_v10 }
 0x245   : > { %v357_v13 = vpop.permute.xlu0 %356  ;;  %v338_v14 = vpop.xlane.xlu1 %337 }
 0x246   : > { %515 = vpow2.f32 %v497_v11  ;;  %v368_v15 = vadd.f32 %v357_v13, %v338_v14 }
 0x247   : > { %517 = vpow2.f32 %v496_v12 }
 0x248   : > { %v498_v16 = vmul.f32 -1.442695, %v368_v15 }
 0x249   : > { %v341_v17 = vpop.xlane.xlu1 %340 }
 0x24a   : > { %519 = vpow2.f32 %v498_v16 }
 0x24d   : > { %v361_v18 = vpop.permute.xlu1 %360 }
 0x24e   : > { %v369_v19 = vadd.f32 %v361_v18, %v341_v17 }
 0x250   : > { %v499_v20 = vmul.f32 -1.442695, %v369_v19 }
 0x252   : > { %521 = vpow2.f32 %v499_v20 }
 0x253   : > { %v516_v21 = vpop.eup %515 }
 0x254   : > { %v518_v22 = vpop.eup %517  ;;  %v383_v24 = vadd.f32 1.0, %v516_v21 }
 0x255   : > { %v382_v23 = vadd.f32 1.0, %v518_v22 }
 0x257   : > { %523 = vrcp.f32 %v382_v23  ;;  %v520_v25 = vpop.eup %519 }
 0x258   : > { %525 = vrcp.f32 %v383_v24  ;;  %v384_v26 = vadd.f32 1.0, %v520_v25 }
 0x25a   : > { %527 = vrcp.f32 %v384_v26 }
 0x25f   : > { %v522_v27 = vpop.eup %521 }
 0x260   : > { %v385_v28 = vadd.f32 1.0, %v522_v27 }
 0x262   : > { %529 = vrcp.f32 %v385_v28 }
 0x264   : > { %v524_v29 = vpop.eup %523 }
 0x265   : > { %396 = vperm.xlu1 %514, %v524_v29   ;;  %v526_v30 = vpop.eup %525 }
 0x267   : > { %v528_v31 = vpop.eup %527 }
 0x269   : > { %401 = vperm.xlu1 %514, %v526_v30  }
 0x26d   : > { %406 = vperm.xlu1 %514, %v528_v31  }
 0x26f   : > { %v530_v32 = vpop.eup %529 }
 0x271   : > { %411 = vperm.xlu1 %514, %v530_v32  }
 0x2e0   : > { %v397_v33 = vpop.permute.xlu1 %396 }
 0x2e1   : > { %v414_v34 = vmul.f32 %v397_v33, %v586_v0  ;;  %v415_v35 = vmul.f32 %v397_v33, %v588_v1 }
 0x2e3   : > { %422 = vst [vmem:[%s224_s15] sm:$0xff] %v414_v34  ;;  %423 = vst [vmem:[%s224_s15 + $0x8] sm:$0xff] %v415_v35 }
 0x2e4   : > { %v402_v36 = vpop.permute.xlu1 %401 }
 0x2e5   : > { %v416_v37 = vmul.f32 %v402_v36, %v596_v5  ;;  %v417_v38 = vmul.f32 %v402_v36, %v598_v6 }
 0x2e7   : > { %424 = vst [vmem:[%s224_s15 + $0x10] sm:$0xff] %v416_v37  ;;  %425 = vst [vmem:[%s224_s15 + $0x18] sm:$0xff] %v417_v38 }
 0x2e8   : > { %v407_v39 = vpop.permute.xlu1 %406 }
 0x2e9   : > { %v418_v40 = vmul.f32 %v407_v39, %v590_v2  ;;  %v419_v41 = vmul.f32 %v407_v39, %v594_v4 }
 0x2eb   : > { %426 = vst [vmem:[%s224_s15 + $0x20] sm:$0xff] %v418_v40  ;;  %427 = vst [vmem:[%s224_s15 + $0x28] sm:$0xff] %v419_v41 }
 0x2ec   : > { %v412_v42 = vpop.permute.xlu1 %411 }
 0x2ed   : > { %v420_v0 = vmul.f32 %v412_v42, %v602_v8  ;;  %v421_v1 = vmul.f32 %v412_v42, %v604_v9 }
 0x2ef   : > { %428 = vst [vmem:[%s224_s15 + $0x30] sm:$0xff] %v420_v0  ;;  %429 = vst [vmem:[%s224_s15 + $0x38] sm:$0xff] %v421_v1 }
 0x2f0 PF: > { %s15_s18 = sadd.s32 1, %s537_s18  }
 0x2f1   : > { %p12_p4 = scmp.ge.s32.totalorder %s15_s18, 4  }
 0x2f3   :  { %14 = sbr.rel (!%p12_p4) target bundleno = 1 (0x1), region = 70 }

</bundles_post_ra>
